<compile_context>
chip_gen: v7x
topology: tpu7x:2x2x1
jax: 0.10.0
libtpu: 0.0.40
codegen_flags: <defaults>
</compile_context>

<pallas_src>
import jax
import jax.numpy as jnp
from jax.experimental import pallas as pl
from jax.experimental.pallas import tpu as pltpu


def _prediction_block_kernel(x_ref, p_ref, o_ref, xp_ref):
    # x_ref : (B, Cin, L)       input, raw PyTorch NCL layout (L on lanes, Cin on sublanes)
    # p_ref : (Cout, 3*Cin+4)   packed params:
    #           cols [t*Cin:(t+1)*Cin] = w1[:, :, t]   (t = 0..2)
    #           col 3*Cin   : gamma, col 3*Cin+1 : beta,
    #           col 3*Cin+2 : w2,    [0, 3*Cin+3] : b2
    # o_ref : (B, L)            output == (B, num_classes)
    # xp_ref: (Cin, L+2)        VMEM scratch: per-batch zero-padded x (pad=1 each side)
    B, Cin, L = x_ref.shape
    Cout = p_ref.shape[0]
    inv_n = 1.0 / float(B * L)

    P = p_ref[...]                                        # (Cout, 3*Cin+4), single load
    gamma = P[:, 3 * Cin:3 * Cin + 1]                     # (Cout, 1)
    beta = P[:, 3 * Cin + 1:3 * Cin + 2]                  # (Cout, 1)
    w2 = P[:, 3 * Cin + 2:3 * Cin + 3]                    # (Cout, 1)
    b2 = P[0:1, 3 * Cin + 3:3 * Cin + 4]                  # (1, 1)

    # Zero the padded staging buffer once; only columns 1..L are overwritten per batch,
    # so the two pad columns stay zero across the (static, tiny) batch loop.
    xp_ref[...] = jnp.zeros_like(xp_ref)

    # ---- Conv1d(Cin -> 2*Cin, k=3, pad=1, bias=False) + one-pass BN statistics ----
    ys = []
    s1 = jnp.zeros((Cout, 1), jnp.float32)
    s2 = jnp.zeros((Cout, 1), jnp.float32)
    for b in range(B):
        xp_ref[:, 1:L + 1] = x_ref[b]                     # stage batch b (Cin, L) into pad buf
        y = None
        for t in range(3):                                # 3 tiny accumulating MXU pushes
            w_t = P[:, t * Cin:(t + 1) * Cin]             # (Cout, Cin) static slice
            tap = xp_ref[:, t:t + L]                      # (Cin, L)  shifted view (im2col)
            c = jnp.dot(w_t, tap,
                        preferred_element_type=jnp.float32,
                        precision=jax.lax.Precision.HIGHEST)
            y = c if y is None else y + c                 # (Cout, L)
        ys.append(y)
        s1 = s1 + jnp.sum(y, axis=-1, keepdims=True)      # lane reduce (XLU)
        s2 = s2 + jnp.sum(y * y, axis=-1, keepdims=True)

    # ---- BatchNorm1d (training-mode batch stats, biased variance, eps=1e-5) ----
    # Single-pass variance is fine at these magnitudes / 1e-4 tolerance.
    mean = s1 * inv_n
    var = s2 * inv_n - mean * mean
    scale = gamma * jax.lax.rsqrt(var + 1e-5)             # rsqrt on EUP slot
    shift = beta - mean * scale

    # ---- LeakyReLU(0.1) + Conv1d(2*Cin -> 1, k=1, bias=True) + row store ----
    for b in range(B):
        yn = ys[b] * scale + shift                        # per-channel FMA (VPU)
        h = jnp.maximum(yn, 0.1 * yn)                     # LeakyReLU(0.1), no mask vreg
        out_b = jnp.sum(h * w2, axis=0, keepdims=True) + b2   # (1, L) sublane reduce
        o_ref[b:b + 1, :] = out_b                         # value starts at lane 0: no rotate


def pack_params(w1_pt, gamma, beta, w2_pt, b2):
    """One-time repack of PyTorch-shaped params into the single kernel operand.
    w1_pt: (Cout, Cin, 3), gamma/beta: (Cout,), w2_pt: (1, Cout, 1), b2: (1,)."""
    Cout, Cin, K = w1_pt.shape
    w1_k = jnp.transpose(w1_pt, (0, 2, 1)).reshape(Cout, K * Cin)   # [o, t*Cin + c]
    b2_col = jnp.zeros((Cout, 1), jnp.float32).at[0, 0].set(b2[0])
    return jnp.concatenate(
        [w1_k,
         gamma.reshape(Cout, 1),
         beta.reshape(Cout, 1),
         w2_pt.reshape(Cout, 1),
         b2_col],
        axis=1).astype(jnp.float32)                                  # (Cout, 3*Cin + 4)


@jax.jit
def prediction_block(x_ncl, params):
    """x_ncl: (B, Cin, L) PyTorch NCL layout (L == num_classes); params: packed (Cout, 3Cin+4).
    Returns (B, num_classes)."""
    B, Cin, L = x_ncl.shape
    vmem = pl.BlockSpec(memory_space=pltpu.MemorySpace.VMEM)
    # Gridless single-shot call: 2 operands, 1 output, one tiny VMEM scratch.
    # (For many independent invocations per step, stack them and add a leading
    #  "parallel" grid axis instead of calling this repeatedly.)
    return pl.pallas_call(
        _prediction_block_kernel,
        out_shape=jax.ShapeDtypeStruct((B, L), jnp.float32),
        in_specs=[vmem, vmem],
        out_specs=vmem,
        scratch_shapes=[pltpu.VMEM((Cin, L + 2), jnp.float32)],
    )(x_ncl.astype(jnp.float32), params)


def reference(x_ncl, w1_pt, gamma, beta, w2_pt, b2):
    """Pure-JAX reference in PyTorch NCL layout (training-mode BatchNorm)."""
    B, Cin, L = x_ncl.shape
    Cout = w1_pt.shape[0]
    xpad = jnp.pad(x_ncl, ((0, 0), (0, 0), (1, 1)))
    y = jnp.zeros((B, Cout, L), jnp.float32)
    for t in range(3):
        y = y + jnp.einsum('oc,bcl->bol', w1_pt[:, :, t], xpad[:, :, t:t + L],
                           precision=jax.lax.Precision.HIGHEST)
    mean = jnp.mean(y, axis=(0, 2), keepdims=True)
    var = jnp.mean((y - mean) ** 2, axis=(0, 2), keepdims=True)
    yn = (y - mean) / jnp.sqrt(var + 1e-5) * gamma.reshape(1, -1, 1) + beta.reshape(1, -1, 1)
    h = jnp.where(yn > 0, yn, 0.1 * yn)
    out = jnp.einsum('oc,bcl->bol', w2_pt.reshape(1, Cout), h,
                     precision=jax.lax.Precision.HIGHEST)[:, 0, :] + b2
    return out


if __name__ == "__main__":
    B, Cin, num_classes = 2, 4, 18          # L must equal num_classes for the final reshape
    Cout = 2 * Cin
    key = jax.random.PRNGKey(0)
    k_x, k_w1, k_w2, k_b2 = jax.random.split(key, 4)

    # input (PyTorch NCL layout)
    x = jax.random.normal(k_x, (B, Cin, num_classes), jnp.float32)

    # deterministic params (PyTorch-shaped), PyTorch-default-style init
    bound1 = 1.0 / (Cin * 3) ** 0.5
    w1_pt = jax.random.uniform(k_w1, (Cout, Cin, 3), jnp.float32, -bound1, bound1)
    gamma = jnp.ones((Cout,), jnp.float32)
    beta = jnp.zeros((Cout,), jnp.float32)
    bound2 = 1.0 / Cout ** 0.5
    w2_pt = jax.random.uniform(k_w2, (1, Cout, 1), jnp.float32, -bound2, bound2)
    b2 = jax.random.uniform(k_b2, (1,), jnp.float32, -bound2, bound2)

    # one-time param repack into a single kernel operand (outside the jitted hot path)
    params = jax.block_until_ready(pack_params(w1_pt, gamma, beta, w2_pt, b2))

    out = prediction_block(x, params)
    out = jax.block_until_ready(out)

    ref = reference(x, w1_pt, gamma, beta, w2_pt, b2)
    assert out.shape == (B, num_classes)
    assert jnp.allclose(out, ref, atol=1e-4, rtol=1e-4)
    print("KERNEL_OK")
</pallas_src>

<mosaic_0001>
module attributes {stable_mosaic.version = 11 : i64} {
  func.func @_prediction_block_kernel(%arg0: memref<2x4x18xf32, #tpu.memory_space<vmem>>, %arg1: memref<8x16xf32, #tpu.memory_space<vmem>>, %arg2: memref<2x18xf32, #tpu.memory_space<vmem>>, %arg3: memref<4x20xf32, #tpu.memory_space<vmem>>) attributes {dimension_semantics = [], scalar_prefetch = 0 : i64, scratch_operands = 1 : i64, tpu.core_type = #tpu.core_type<tc>} {
    %c0 = arith.constant 0 : index
    %c0_0 = arith.constant 0 : index
    %0 = vector.load %arg1[%c0, %c0_0] : memref<8x16xf32, #tpu.memory_space<vmem>>, vector<8x16xf32>
    %1 = vector.extract_strided_slice %0 {offsets = [0, 12], sizes = [8, 1], strides = [1, 1]} : vector<8x16xf32> to vector<8x1xf32>
    %2 = vector.extract_strided_slice %0 {offsets = [0, 13], sizes = [8, 1], strides = [1, 1]} : vector<8x16xf32> to vector<8x1xf32>
    %3 = vector.extract_strided_slice %0 {offsets = [0, 14], sizes = [8, 1], strides = [1, 1]} : vector<8x16xf32> to vector<8x1xf32>
    %4 = vector.extract_strided_slice %0 {offsets = [0, 15], sizes = [1, 1], strides = [1, 1]} : vector<8x16xf32> to vector<1x1xf32>
    %cst = arith.constant 0.000000e+00 : f32
    %5 = vector.broadcast %cst : f32 to vector<4x20xf32>
    %c0_1 = arith.constant 0 : index
    %c0_2 = arith.constant 0 : index
    %6 = vector.load %arg3[%c0_1, %c0_2] : memref<4x20xf32, #tpu.memory_space<vmem>>, vector<4x20xf32>
    tpu.vector_store %arg3[%c0_1, %c0_2], %5 {strides = array<i32>} : memref<4x20xf32, #tpu.memory_space<vmem>>, vector<4x20xf32>,
    %cst_3 = arith.constant 0.000000e+00 : f32
    %7 = vector.broadcast %cst_3 : f32 to vector<8x1xf32>
    %cst_4 = arith.constant 0.000000e+00 : f32
    %8 = vector.broadcast %cst_4 : f32 to vector<8x1xf32>
    %c0_5 = arith.constant 0 : index
    %c0_6 = arith.constant 0 : index
    %c0_7 = arith.constant 0 : index
    %9 = vector.load %arg0[%c0_5, %c0_6, %c0_7] : memref<2x4x18xf32, #tpu.memory_space<vmem>>, vector<1x4x18xf32>
    %10 = vector.shape_cast %9 : vector<1x4x18xf32> to vector<4x18xf32>
    %c0_8 = arith.constant 0 : index
    %c1 = arith.constant 1 : index
    %11 = vector.load %arg3[%c0_8, %c1] : memref<4x20xf32, #tpu.memory_space<vmem>>, vector<4x18xf32>
    tpu.vector_store %arg3[%c0_8, %c1], %10 {strides = array<i32>} : memref<4x20xf32, #tpu.memory_space<vmem>>, vector<4x18xf32>,
    %12 = vector.extract_strided_slice %0 {offsets = [0, 0], sizes = [8, 4], strides = [1, 1]} : vector<8x16xf32> to vector<8x4xf32>
    %c0_9 = arith.constant 0 : index
    %c0_10 = arith.constant 0 : index
    %13 = vector.load %arg3[%c0_9, %c0_10] : memref<4x20xf32, #tpu.memory_space<vmem>>, vector<4x18xf32>
    %cst_11 = arith.constant dense<0.000000e+00> : vector<8x18xf32>
    %14 = tpu.matmul %12, %13, %cst_11 {dimension_numbers = #tpu.dot_dimension_numbers<[1], [0], [0], [1], [0, 0, 1, 1], [], []>, precision = #tpu.contract_precision<fp32>} : vector<8x4xf32>, vector<4x18xf32>, vector<8x18xf32> -> vector<8x18xf32>
    %15 = vector.extract_strided_slice %0 {offsets = [0, 4], sizes = [8, 4], strides = [1, 1]} : vector<8x16xf32> to vector<8x4xf32>
    %c0_12 = arith.constant 0 : index
    %c1_13 = arith.constant 1 : index
    %16 = vector.load %arg3[%c0_12, %c1_13] : memref<4x20xf32, #tpu.memory_space<vmem>>, vector<4x18xf32>
    %cst_14 = arith.constant dense<0.000000e+00> : vector<8x18xf32>
    %17 = tpu.matmul %15, %16, %cst_14 {dimension_numbers = #tpu.dot_dimension_numbers<[1], [0], [0], [1], [0, 0, 1, 1], [], []>, precision = #tpu.contract_precision<fp32>} : vector<8x4xf32>, vector<4x18xf32>, vector<8x18xf32> -> vector<8x18xf32>
    %18 = arith.addf %14, %17 : vector<8x18xf32>
    %19 = vector.extract_strided_slice %0 {offsets = [0, 8], sizes = [8, 4], strides = [1, 1]} : vector<8x16xf32> to vector<8x4xf32>
    %c0_15 = arith.constant 0 : index
    %c2 = arith.constant 2 : index
    %20 = vector.load %arg3[%c0_15, %c2] : memref<4x20xf32, #tpu.memory_space<vmem>>, vector<4x18xf32>
    %cst_16 = arith.constant dense<0.000000e+00> : vector<8x18xf32>
    %21 = tpu.matmul %19, %20, %cst_16 {dimension_numbers = #tpu.dot_dimension_numbers<[1], [0], [0], [1], [0, 0, 1, 1], [], []>, precision = #tpu.contract_precision<fp32>} : vector<8x4xf32>, vector<4x18xf32>, vector<8x18xf32> -> vector<8x18xf32>
    %22 = arith.addf %18, %21 : vector<8x18xf32>
    %cst_17 = arith.constant dense<0.000000e+00> : vector<8xf32>
    %23 = vector.multi_reduction <add>, %22, %cst_17 [1] : vector<8x18xf32> to vector<8xf32>
    %24 = vector.shape_cast %23 : vector<8xf32> to vector<8x1xf32>
    %25 = arith.addf %7, %24 : vector<8x1xf32>
    %26 = arith.mulf %22, %22 : vector<8x18xf32>
    %cst_18 = arith.constant dense<0.000000e+00> : vector<8xf32>
    %27 = vector.multi_reduction <add>, %26, %cst_18 [1] : vector<8x18xf32> to vector<8xf32>
    %28 = vector.shape_cast %27 : vector<8xf32> to vector<8x1xf32>
    %29 = arith.addf %8, %28 : vector<8x1xf32>
    %c1_19 = arith.constant 1 : index
    %c0_20 = arith.constant 0 : index
    %c0_21 = arith.constant 0 : index
    %30 = vector.load %arg0[%c1_19, %c0_20, %c0_21] : memref<2x4x18xf32, #tpu.memory_space<vmem>>, vector<1x4x18xf32>
    %31 = vector.shape_cast %30 : vector<1x4x18xf32> to vector<4x18xf32>
    %c0_22 = arith.constant 0 : index
    %c1_23 = arith.constant 1 : index
    %32 = vector.load %arg3[%c0_22, %c1_23] : memref<4x20xf32, #tpu.memory_space<vmem>>, vector<4x18xf32>
    tpu.vector_store %arg3[%c0_22, %c1_23], %31 {strides = array<i32>} : memref<4x20xf32, #tpu.memory_space<vmem>>, vector<4x18xf32>,
    %33 = vector.extract_strided_slice %0 {offsets = [0, 0], sizes = [8, 4], strides = [1, 1]} : vector<8x16xf32> to vector<8x4xf32>
    %c0_24 = arith.constant 0 : index
    %c0_25 = arith.constant 0 : index
    %34 = vector.load %arg3[%c0_24, %c0_25] : memref<4x20xf32, #tpu.memory_space<vmem>>, vector<4x18xf32>
    %cst_26 = arith.constant dense<0.000000e+00> : vector<8x18xf32>
    %35 = tpu.matmul %33, %34, %cst_26 {dimension_numbers = #tpu.dot_dimension_numbers<[1], [0], [0], [1], [0, 0, 1, 1], [], []>, precision = #tpu.contract_precision<fp32>} : vector<8x4xf32>, vector<4x18xf32>, vector<8x18xf32> -> vector<8x18xf32>
    %36 = vector.extract_strided_slice %0 {offsets = [0, 4], sizes = [8, 4], strides = [1, 1]} : vector<8x16xf32> to vector<8x4xf32>
    %c0_27 = arith.constant 0 : index
    %c1_28 = arith.constant 1 : index
    %37 = vector.load %arg3[%c0_27, %c1_28] : memref<4x20xf32, #tpu.memory_space<vmem>>, vector<4x18xf32>
    %cst_29 = arith.constant dense<0.000000e+00> : vector<8x18xf32>
    %38 = tpu.matmul %36, %37, %cst_29 {dimension_numbers = #tpu.dot_dimension_numbers<[1], [0], [0], [1], [0, 0, 1, 1], [], []>, precision = #tpu.contract_precision<fp32>} : vector<8x4xf32>, vector<4x18xf32>, vector<8x18xf32> -> vector<8x18xf32>
    %39 = arith.addf %35, %38 : vector<8x18xf32>
    %40 = vector.extract_strided_slice %0 {offsets = [0, 8], sizes = [8, 4], strides = [1, 1]} : vector<8x16xf32> to vector<8x4xf32>
    %c0_30 = arith.constant 0 : index
    %c2_31 = arith.constant 2 : index
    %41 = vector.load %arg3[%c0_30, %c2_31] : memref<4x20xf32, #tpu.memory_space<vmem>>, vector<4x18xf32>
    %cst_32 = arith.constant dense<0.000000e+00> : vector<8x18xf32>
    %42 = tpu.matmul %40, %41, %cst_32 {dimension_numbers = #tpu.dot_dimension_numbers<[1], [0], [0], [1], [0, 0, 1, 1], [], []>, precision = #tpu.contract_precision<fp32>} : vector<8x4xf32>, vector<4x18xf32>, vector<8x18xf32> -> vector<8x18xf32>
    %43 = arith.addf %39, %42 : vector<8x18xf32>
    %cst_33 = arith.constant dense<0.000000e+00> : vector<8xf32>
    %44 = vector.multi_reduction <add>, %43, %cst_33 [1] : vector<8x18xf32> to vector<8xf32>
    %45 = vector.shape_cast %44 : vector<8xf32> to vector<8x1xf32>
    %46 = arith.addf %25, %45 : vector<8x1xf32>
    %47 = arith.mulf %43, %43 : vector<8x18xf32>
    %cst_34 = arith.constant dense<0.000000e+00> : vector<8xf32>
    %48 = vector.multi_reduction <add>, %47, %cst_34 [1] : vector<8x18xf32> to vector<8xf32>
    %49 = vector.shape_cast %48 : vector<8xf32> to vector<8x1xf32>
    %50 = arith.addf %29, %49 : vector<8x1xf32>
    %cst_35 = arith.constant 0.027777778 : f32
    %51 = vector.broadcast %cst_35 : f32 to vector<8x1xf32>
    %52 = arith.mulf %46, %51 : vector<8x1xf32>
    %cst_36 = arith.constant 0.027777778 : f32
    %53 = vector.broadcast %cst_36 : f32 to vector<8x1xf32>
    %54 = arith.mulf %50, %53 : vector<8x1xf32>
    %55 = arith.mulf %52, %52 : vector<8x1xf32>
    %56 = arith.subf %54, %55 : vector<8x1xf32>
    %cst_37 = arith.constant 9.99999974E-6 : f32
    %57 = vector.broadcast %cst_37 : f32 to vector<8x1xf32>
    %58 = arith.addf %56, %57 : vector<8x1xf32>
    %59 = math.rsqrt %58 : vector<8x1xf32>
    %60 = arith.mulf %1, %59 : vector<8x1xf32>
    %61 = arith.mulf %52, %60 : vector<8x1xf32>
    %62 = arith.subf %2, %61 : vector<8x1xf32>
    %63 = vector.broadcast %60 : vector<8x1xf32> to vector<8x18xf32>
    %64 = arith.mulf %22, %63 : vector<8x18xf32>
    %65 = vector.broadcast %62 : vector<8x1xf32> to vector<8x18xf32>
    %66 = arith.addf %64, %65 : vector<8x18xf32>
    %cst_38 = arith.constant 1.000000e-01 : f32
    %67 = vector.broadcast %cst_38 : f32 to vector<8x18xf32>
    %68 = arith.mulf %67, %66 : vector<8x18xf32>
    %69 = arith.maximumf %66, %68 : vector<8x18xf32>
    %70 = vector.broadcast %3 : vector<8x1xf32> to vector<8x18xf32>
    %71 = arith.mulf %69, %70 : vector<8x18xf32>
    %cst_39 = arith.constant dense<0.000000e+00> : vector<18xf32>
    %72 = vector.multi_reduction <add>, %71, %cst_39 [0] : vector<8x18xf32> to vector<18xf32>
    %73 = vector.shape_cast %72 : vector<18xf32> to vector<1x18xf32>
    %74 = vector.broadcast %4 : vector<1x1xf32> to vector<1x18xf32>
    %75 = arith.addf %73, %74 : vector<1x18xf32>
    %c0_40 = arith.constant 0 : index
    %c0_41 = arith.constant 0 : index
    %76 = vector.load %arg2[%c0_40, %c0_41] : memref<2x18xf32, #tpu.memory_space<vmem>>, vector<1x18xf32>
    tpu.vector_store %arg2[%c0_40, %c0_41], %75 {strides = array<i32>} : memref<2x18xf32, #tpu.memory_space<vmem>>, vector<1x18xf32>,
    %77 = vector.broadcast %60 : vector<8x1xf32> to vector<8x18xf32>
    %78 = arith.mulf %43, %77 : vector<8x18xf32>
    %79 = vector.broadcast %62 : vector<8x1xf32> to vector<8x18xf32>
    %80 = arith.addf %78, %79 : vector<8x18xf32>
    %cst_42 = arith.constant 1.000000e-01 : f32
    %81 = vector.broadcast %cst_42 : f32 to vector<8x18xf32>
    %82 = arith.mulf %81, %80 : vector<8x18xf32>
    %83 = arith.maximumf %80, %82 : vector<8x18xf32>
    %84 = vector.broadcast %3 : vector<8x1xf32> to vector<8x18xf32>
    %85 = arith.mulf %83, %84 : vector<8x18xf32>
    %cst_43 = arith.constant dense<0.000000e+00> : vector<18xf32>
    %86 = vector.multi_reduction <add>, %85, %cst_43 [0] : vector<8x18xf32> to vector<18xf32>
    %87 = vector.shape_cast %86 : vector<18xf32> to vector<1x18xf32>
    %88 = vector.broadcast %4 : vector<1x1xf32> to vector<1x18xf32>
    %89 = arith.addf %87, %88 : vector<1x18xf32>
    %c1_44 = arith.constant 1 : index
    %c0_45 = arith.constant 0 : index
    %90 = vector.load %arg2[%c1_44, %c0_45] : memref<2x18xf32, #tpu.memory_space<vmem>>, vector<1x18xf32>
    tpu.vector_store %arg2[%c1_44, %c0_45], %89 {strides = array<i32>} : memref<2x18xf32, #tpu.memory_space<vmem>>, vector<1x18xf32>,
    return
  }
}

</mosaic_0001>

<bundles_post_ra>
// kernel: prediction_block.1
= control target key start
LH: loop header
LB: loop body
LE: loop exit
PB: predicated region body
PF: predicated region fallthrough
CT: control target
= control target key end

     0   :  { %7 = vsyncpa [#allocation4], 0  ;;  %s3538_s0 = inlined_call_operand.hbm [shape: f32[2,4,18], index: 0, kind: input, shape index: {}]   ;;  %s3539_s1 = inlined_call_operand.hbm [shape: f32[8,16], index: 1, kind: input, shape index: {}]   ;;  %s3540_s2 = inlined_call_operand.hbm [shape: f32[2,18], index: 2, kind: output, shape index: {}]  }
   0x1   :  { %8 = vsyncpa [#allocation7], 0 }
   0x2   :  { %9 = vsyncpa [#allocation5], 0  ;;  %s3280_s9 = smov [#allocation3]   ;;  %s3208_s13 = scalar_lea.hbm %s3538_s0, 128 }
   0x3   :  { %s15_s10 = sshll.u32 %s3280_s9, 4  ;;  %p3209_p0 = scmp.ne.s32.totalorder %s3538_s0, %s3208_s13  ;;  %s16_s10 = int_to_ptr.vmem [resolvable:$true] %s15_s10 }
   0x4   :  { %p3212_p1 = scmp.lt.u32.totalorder %s3208_s13, %s3538_s0 }
   0x6   :  { %p3214_p2 = pnand %p3212_p1, %p3209_p0 }
   0x8   :  { %3217 = shalt.err (!%p3214_p2)
}
   0x9   :  { %s3218_s18 = scalar_lea.vmem %s16_s10, 128  ;;  %p3223_p4 = scmp.lt.s32.totalorder %s16_s10, %s16_s10 }
   0xa   :  { %p3219_p3 = scmp.ne.s32.totalorder %s16_s10, %s3218_s18  ;;  %p3224_p5 = scmp.lt.s32.totalorder %s3218_s18, %s3218_s18 }
   0xc   :  { %p3225_p6 = por %p3224_p5, %p3223_p4 }
   0xe   :  { %p3226_p7 = pnand %p3225_p6, %p3219_p3 }
  0x10   :  { %3229 = shalt.err (!%p3226_p7)
}
  0x11   :  { %s3281_s19 = smov 64   ;;  %s3282_s20 = smov 4  }
  0x12   :  { %21 = dma.hbm_to_vmem [thread:$0]  %s3538_s0, 128, %s16_s10, [#allocation4], %s3281_s19, %s3281_s19, %s3282_s20  }
  0x13   :  { %s3283_s23 = smov [#allocation6]   ;;  %s3230_s27 = scalar_lea.hbm %s3539_s1, 128 }
  0x14   :  { %s28_s24 = sshll.u32 %s3283_s23, 4  ;;  %p3231_p8 = scmp.ne.s32.totalorder %s3539_s1, %s3230_s27  ;;  %s29_s24 = int_to_ptr.vmem [resolvable:$true] %s28_s24 }
  0x15   :  { %p3234_p9 = scmp.lt.u32.totalorder %s3230_s27, %s3539_s1 }
  0x17   :  { %p3236_p10 = pnand %p3234_p9, %p3231_p8 }
  0x19   :  { %3239 = shalt.err (!%p3236_p10)
}
  0x1a   :  { %s3240_s4 = scalar_lea.vmem %s29_s24, 128  ;;  %p3245_p12 = scmp.lt.s32.totalorder %s29_s24, %s29_s24 }
  0x1b   :  { %p3241_p11 = scmp.ne.s32.totalorder %s29_s24, %s3240_s4  ;;  %p3246_p13 = scmp.lt.s32.totalorder %s3240_s4, %s3240_s4 }
  0x1d   :  { %p3247_p0 = por %p3246_p13, %p3245_p12 }
  0x1f   :  { %p3248_p1 = pnand %p3247_p0, %p3241_p11 }
  0x21   :  { %3251 = shalt.err (!%p3248_p1)
}
  0x22   :  { %31 = dma.hbm_to_vmem [thread:$0]  %s3539_s1, 128, %s29_s24, [#allocation7]  }
  0x23   :  { %3274 = dma.done.wait [#allocation4], 128  }
  0x24   :  { %3275 = vsyncadd [#allocation4], 4294967168 }
  0x25   :  { %3276 = dma.done.wait [#allocation7], 128  }
  0x26   :  { %3277 = vsyncadd [#allocation7], 4294967168  ;;  %vm39_vm0 = vcmask 158720   ;;  %v3284_v0 = vmov 0.0   ;;  %v41_v1 = vld [vmem:[#allocation3] sm:$0xf] }
  0x27   :  { %40 = vst.msk [vmem:[#allocation2] sm:$0xf] %vm39_vm0, %v3284_v0  ;;  %2937 = vmatprep.subr.mxu0 %v3284_v0  ;;  %3027 = vmatprep.subr.mxu1 %v3284_v0  ;;  %v3338_v2 = vld [vmem:[#allocation6] sm:$0xff]  ;;  %s3285_s6 = smov 1   ;;  %s3286_s7 = smov 124   ;;  %vm46_vm1 = vcmask 150536  }
  0x28   :  { %43 = vrot.lane.b32.xlu0 %v41_v1, %s3285_s6  ;;  %50 = vrot.lane.b32.xlu1 %v3338_v2, %s3286_s7  ;;  %v1423_v3 = vld [vmem:[#allocation3 + $0x4] sm:$0xf]  ;;  %vm3287_vm2 = vmmov 0   ;;  %s3288_s1 = smov 127   ;;  %s3289_s8 = smov 120   ;;  %vm55_vm3 = vcmask 31744  }
  0x29   :  { %2939 = vmatprep.mubr.msk.f32.mxu0 %vm3287_vm2, %v3284_v0  ;;  %3029 = vmatprep.mubr.msk.f32.mxu1 %vm3287_vm2, %v3284_v0  ;;  %s3290_s9 = smov 126   ;;  %vm58_vm4 = vcmask 1043456   ;;  %v507_v29 = vsel %vm55_vm3, %v3338_v2, 0  ;;  %vm1412_vm5 = vcmask 146432   ;;  %s3295_s10 = smov [#allocation8]   ;;  %vm2833_vm6 = vcmask 139264  }
  0x2a   :  { %v3390_v31 = vand.u32 4294901760, %v507_v29  ;;  %s2855_s11 = sshll.u32 %s3295_s10, 4  ;;  %s2856_s11 = int_to_ptr.vmem [resolvable:$true] %s2855_s11 }
  0x2b   :  { %s3252_s12 = scalar_lea.vmem %s2856_s11, 32  ;;  %p3257_p3 = scmp.lt.s32.totalorder %s2856_s11, %s2856_s11 }
  0x2c   :  { %1425 = vrot.lane.b32.xlu0 %v1423_v3, %s3285_s6  ;;  %v578_v33 = vsub.f32 %v507_v29, %v3390_v31  ;;  %p3253_p2 = scmp.ne.s32.totalorder %s2856_s11, %s3252_s12  ;;  %p3258_p4 = scmp.lt.s32.totalorder %s3252_s12, %s3252_s12 }
  0x2e   :  { %v579_v35 = vand.u32 4294901760, %v578_v33  ;;  %p3259_p5 = por %p3258_p4, %p3257_p3 }
  0x30   :  { %v580_v39 = vsub.f32 %v578_v33, %v579_v35  ;;  %p3260_p6 = pnand %p3259_p5, %p3253_p2 }
  0x32   :  { %v581_v42 = vand.u32 4294901760, %v580_v39 }
  0x9a   :  { %v44_v4 = vpop.permute.xlu0 %43  ;;  %v51_v8 = vpop.permute.xlu1 %50 }
  0x9b   :  { %47 = vst.msk [vmem:[#allocation2] sm:$0xf] %vm46_vm1, %v44_v4  ;;  %v56_v9 = vsel %vm55_vm3, %v51_v8, 0 }
  0x9c   :  { %v3357_v10 = vand.u32 4294901760, %v56_v9 }
  0x9e   :  { %v1426_v5 = vpop.permute.xlu0 %1425  ;;  %v128_v11 = vsub.f32 %v56_v9, %v3357_v10 }
  0xa0   :  { %v129_v12 = vand.u32 4294901760, %v128_v11 }
  0xa2   :  { %v3347_v6 = vld [vmem:[#allocation2] sm:$0xf]  ;;  %v130_v13 = vsub.f32 %v128_v11, %v129_v12 }
  0xa3   :  { %1428 = vst.msk [vmem:[#allocation2] sm:$0xf] %vm46_vm1, %v1426_v5  ;;  %53 = vrot.lane.b32.xlu1 %v3347_v6, %s3288_s1  ;;  %v509_v30 = vsel %vm58_vm4, %v3347_v6, 0 }
  0xa4   :  { %v131_v17 = vand.u32 4294901760, %v130_v13  ;;  %v3393_v32 = vand.u32 4294901760, %v509_v30 }
  0xa6   :  { %v589_v34 = vsub.f32 %v509_v30, %v3393_v32 }
  0xa7   :  { %957 = vrot.lane.b32.xlu1 %v3338_v2, %s3289_s8 }
  0xa8   :  { %v590_v37 = vand.u32 4294901760, %v589_v34 }
  0xaa   :  { %v3351_v7 = vld [vmem:[#allocation2] sm:$0xf]  ;;  %v591_v40 = vsub.f32 %v589_v34, %v590_v37 }
  0xab   :  { %1431 = vrot.lane.b32.xlu0 %v3351_v7, %s3288_s1  ;;  %2329 = vrot.lane.b32.xlu1 %v3351_v7, %s3290_s9  ;;  %v1881_v36 = vsel %vm58_vm4, %v3351_v7, 0 }
  0xac   :  { %v3406_v38 = vand.u32 4294901760, %v1881_v36  ;;  %v592_v43 = vand.u32 4294901760, %v591_v40 }
  0xae   :  { %v1961_v41 = vsub.f32 %v1881_v36, %v3406_v38 }
  0xaf   :  { %959 = vrot.lane.b32.xlu0 %v3347_v6, %s3290_s9 }
  0xb0   :  { %v1962_v44 = vand.u32 4294901760, %v1961_v41 }
  0xb2   :  { %v1963_v45 = vsub.f32 %v1961_v41, %v1962_v44 }
  0xb4   :  { %v1964_v46 = vand.u32 4294901760, %v1963_v45 }
 0x115   :  { %v54_v14 = vpop.permute.xlu1 %53 }
 0x116   :  { %v59_v15 = vsel %vm58_vm4, %v54_v14, 0 }
 0x117   :  { %v62_v16 = vand.u32 4294901760, %v59_v15 }
 0x119   :  { %v139_v18 = vsub.f32 %v59_v15, %v62_v16  ;;  %2938 = vmatpush3.msra.mxu0 %v62_v16  ;;  %v958_v48 = vpop.permute.xlu1 %957  ;;  %v3291_v15 = vmov 12  }
 0x11a   :  { %2940 = vmatmul.mubr.f32.vlgmr.msra.gmra.mrb[0].mxu0 %v131_v17  ;;  %2942 = vmatprep.subr.mxu0 %v3284_v0  ;;  %v961_v49 = vsel %vm55_vm3, %v958_v48, 0 }
 0x11b   :  { %v140_v19 = vand.u32 4294901760, %v139_v18  ;;  %2944 = vmatprep.mubr.msk.f32.mxu0 %vm3287_vm2, %v3284_v0  ;;  %v3450_v51 = vand.u32 4294901760, %v961_v49  ;;  %3201 = vset.pattern.permute.xlu0 %v3291_v15 }
 0x11d   :  { %v141_v20 = vsub.f32 %v139_v18, %v140_v19  ;;  %v1432_v21 = vpop.permute.xlu0 %1431  ;;  %v1032_v53 = vsub.f32 %v961_v49, %v3450_v51  ;;  %v2330_v54 = vpop.permute.xlu1 %2329 }
 0x11e   :  { %v1433_v22 = vsel %vm58_vm4, %v1432_v21, 0  ;;  %v2331_v56 = vsel %vm58_vm4, %v2330_v54, 0 }
 0x11f   :  { %v142_v23 = vand.u32 4294901760, %v141_v20  ;;  %v1436_v24 = vand.u32 4294901760, %v1433_v22  ;;  %v1033_v57 = vand.u32 4294901760, %v1032_v53  ;;  %v2334_v59 = vand.u32 4294901760, %v2331_v56 }
 0x121   :  { %v1513_v25 = vsub.f32 %v1433_v22, %v1436_v24  ;;  %3028 = vmatpush3.msra.mxu1 %v1436_v24  ;;  %2943 = vmatpush3.msra.mxu0 %v142_v23  ;;  %v960_v47 = vpop.permute.xlu0 %959  ;;  %v1034_v60 = vsub.f32 %v1032_v53, %v1033_v57  ;;  %v2411_v62 = vsub.f32 %v2331_v56, %v2334_v59 }
 0x122   :  { %2945 = vmatmul.mubr.f32.vlgmr.msra.gmra.mrb[0].mxu0 %v3357_v10  ;;  %2947 = vmatprep.subr.mxu0 %v3284_v0  ;;  %v963_v50 = vsel %vm58_vm4, %v960_v47, 0 }
 0x123   :  { %v1514_v26 = vand.u32 4294901760, %v1513_v25  ;;  %3030 = vmatmul.mubr.f32.vlgmr.msra.gmra.mrb[0].mxu1 %v131_v17  ;;  %2948 = vmatpush3.msra.mxu0 %v139_v18  ;;  %v3452_v52 = vand.u32 4294901760, %v963_v50  ;;  %v1035_v63 = vand.u32 4294901760, %v1034_v60  ;;  %v2412_v3 = vand.u32 4294901760, %v2411_v62 }
 0x124   :  { %3032 = vmatprep.subr.mxu1 %v3284_v0  ;;  %2949 = vmatprep.mubr.msk.f32.mxu0 %vm3287_vm2, %v3284_v0 }
 0x125   :  { %v1515_v27 = vsub.f32 %v1513_v25, %v1514_v26  ;;  %2952 = vmatprep.subr.mxu0 %v3284_v0  ;;  %3034 = vmatprep.mubr.msk.f32.mxu1 %vm3287_vm2, %v3284_v0  ;;  %v1043_v55 = vsub.f32 %v963_v50, %v3452_v52  ;;  %v2413_v4 = vsub.f32 %v2411_v62, %v2412_v3 }
 0x127   :  { %v1516_v28 = vand.u32 4294901760, %v1515_v27  ;;  %v1044_v58 = vand.u32 4294901760, %v1043_v55  ;;  %v2414_v5 = vand.u32 4294901760, %v2413_v4  ;;  %v3292_v27 = vmov 13  }
 0x128   :  { %3202 = vset.pattern.permute.xlu1 %v3292_v27 }
 0x129   :  { %3033 = vmatpush3.msra.mxu1 %v1516_v28  ;;  %v1045_v61 = vsub.f32 %v1043_v55, %v1044_v58 }
 0x12a   :  { %2950 = vmatmul.mubr.f32.vlgmr.msra.gmra.mrb[0].mxu0 %v128_v11  ;;  %3037 = vmatprep.subr.mxu1 %v3284_v0 }
 0x12b   :  { %2953 = vmatpush3.msra.mxu0 %v62_v16  ;;  %3035 = vmatmul.mubr.f32.vlgmr.msra.gmra.mrb[0].mxu1 %v3357_v10  ;;  %v1046_v1 = vand.u32 4294901760, %v1045_v61 }
 0x12c   :  { %3038 = vmatpush3.msra.mxu1 %v1513_v25  ;;  %2954 = vmatprep.mubr.msk.f32.mxu0 %vm3287_vm2, %v3284_v0 }
 0x12d   :  { %2957 = vmatprep.subr.mxu0 %v3284_v0  ;;  %3039 = vmatprep.mubr.msk.f32.mxu1 %vm3287_vm2, %v3284_v0 }
 0x12e   :  { %3042 = vmatprep.subr.mxu1 %v3284_v0 }
 0x132   :  { %2955 = vmatmul.mubr.f32.vlgmr.msra.gmra.mrb[0].mxu0 %v129_v12 }
 0x133   :  { %2958 = vmatpush3.msra.mxu0 %v140_v19  ;;  %3040 = vmatmul.mubr.f32.vlgmr.msra.gmra.mrb[0].mxu1 %v128_v11 }
 0x134   :  { %3043 = vmatpush3.msra.mxu1 %v1436_v24  ;;  %2959 = vmatprep.mubr.msk.f32.mxu0 %vm3287_vm2, %v3284_v0 }
 0x135   :  { %2962 = vmatprep.subr.mxu0 %v3284_v0  ;;  %3044 = vmatprep.mubr.msk.f32.mxu1 %vm3287_vm2, %v3284_v0 }
 0x136   :  { %3047 = vmatprep.subr.mxu1 %v3284_v0 }
 0x13a   :  { %2960 = vmatmul.mubr.f32.vlgmr.msra.gmra.mrb[0].mxu0 %v3357_v10 }
 0x13b   :  { %2963 = vmatpush3.msra.mxu0 %v62_v16  ;;  %3045 = vmatmul.mubr.f32.vlgmr.msra.gmra.mrb[0].mxu1 %v129_v12 }
 0x13c   :  { %3048 = vmatpush3.msra.mxu1 %v1514_v26  ;;  %2964 = vmatprep.mubr.msk.f32.mxu0 %vm3287_vm2, %v3284_v0 }
 0x13d   :  { %2967 = vmatprep.subr.mxu0 %v3284_v0  ;;  %3049 = vmatprep.mubr.msk.f32.mxu1 %vm3287_vm2, %v3284_v0 }
 0x13e   :  { %3052 = vmatprep.subr.mxu1 %v3284_v0 }
 0x142   :  { %2965 = vmatmul.mubr.f32.vlgmr.msra.gmra.mrb[0].mxu0 %v3357_v10 }
 0x143   :  { %2968 = vmatpush3.msra.mxu0 %v3393_v32  ;;  %3050 = vmatmul.mubr.f32.vlgmr.msra.gmra.mrb[0].mxu1 %v3357_v10 }
 0x144   :  { %3053 = vmatpush3.msra.mxu1 %v1436_v24  ;;  %2969 = vmatprep.mubr.msk.f32.mxu0 %vm3287_vm2, %v3284_v0 }
 0x145   :  { %2972 = vmatprep.subr.mxu0 %v3284_v0  ;;  %3054 = vmatprep.mubr.msk.f32.mxu1 %vm3287_vm2, %v3284_v0 }
 0x146   :  { %3057 = vmatprep.subr.mxu1 %v3284_v0 }
 0x14a   :  { %2970 = vmatmul.mubr.f32.vlgmr.msra.gmra.mrb[0].mxu0 %v581_v42 }
 0x14b   :  { %2973 = vmatpush3.msra.mxu0 %v592_v43  ;;  %3055 = vmatmul.mubr.f32.vlgmr.msra.gmra.mrb[0].mxu1 %v3357_v10 }
 0x14c   :  { %3058 = vmatpush3.msra.mxu1 %v3406_v38  ;;  %2974 = vmatprep.mubr.msk.f32.mxu0 %vm3287_vm2, %v3284_v0 }
 0x14d   :  { %2977 = vmatprep.subr.mxu0 %v3284_v0  ;;  %3059 = vmatprep.mubr.msk.f32.mxu1 %vm3287_vm2, %v3284_v0 }
 0x14e   :  { %3062 = vmatprep.subr.mxu1 %v3284_v0 }
 0x152   :  { %2975 = vmatmul.mubr.f32.vlgmr.msra.gmra.mrb[0].mxu0 %v3390_v31 }
 0x153   :  { %2978 = vmatpush3.msra.mxu0 %v589_v34  ;;  %3060 = vmatmul.mubr.f32.vlgmr.msra.gmra.mrb[0].mxu1 %v581_v42  ;;  %v3294_v34 = vmov 14  }
 0x154   :  { %3063 = vmatpush3.msra.mxu1 %v1964_v46  ;;  %2979 = vmatprep.mubr.msk.f32.mxu0 %vm3287_vm2, %v3284_v0 }
 0x155   :  { %2982 = vmatprep.subr.mxu0 %v3284_v0  ;;  %3064 = vmatprep.mubr.msk.f32.mxu1 %vm3287_vm2, %v3284_v0 }
 0x156   :  { %3067 = vmatprep.subr.mxu1 %v3284_v0 }
 0x15a   :  { %2980 = vmatmul.mubr.f32.vlgmr.msra.gmra.mrb[0].mxu0 %v578_v33 }
 0x15b   :  { %2983 = vmatpush3.msra.mxu0 %v3393_v32  ;;  %3065 = vmatmul.mubr.f32.vlgmr.msra.gmra.mrb[0].mxu1 %v3390_v31 }
 0x15c   :  { %3068 = vmatpush3.msra.mxu1 %v1961_v41  ;;  %2984 = vmatprep.mubr.msk.f32.mxu0 %vm3287_vm2, %v3284_v0 }
 0x15d   :  { %2987 = vmatprep.subr.mxu0 %v3284_v0  ;;  %3069 = vmatprep.mubr.msk.f32.mxu1 %vm3287_vm2, %v3284_v0 }
 0x15e   :  { %3072 = vmatprep.subr.mxu1 %v3284_v0 }
 0x162   :  { %2985 = vmatmul.mubr.f32.vlgmr.msra.gmra.mrb[0].mxu0 %v579_v35 }
 0x163   :  { %2988 = vmatpush3.msra.mxu0 %v590_v37  ;;  %3070 = vmatmul.mubr.f32.vlgmr.msra.gmra.mrb[0].mxu1 %v578_v33 }
 0x164   :  { %3073 = vmatpush3.msra.mxu1 %v3406_v38  ;;  %2989 = vmatprep.mubr.msk.f32.mxu0 %vm3287_vm2, %v3284_v0 }
 0x165   :  { %2992 = vmatprep.subr.mxu0 %v3284_v0  ;;  %3074 = vmatprep.mubr.msk.f32.mxu1 %vm3287_vm2, %v3284_v0 }
 0x166   :  { %3077 = vmatprep.subr.mxu1 %v3284_v0 }
 0x16a   :  { %2990 = vmatmul.mubr.f32.vlgmr.msra.gmra.mrb[0].mxu0 %v3390_v31 }
 0x16b   :  { %2993 = vmatpush3.msra.mxu0 %v3393_v32  ;;  %3075 = vmatmul.mubr.f32.vlgmr.msra.gmra.mrb[0].mxu1 %v579_v35 }
 0x16c   :  { %3078 = vmatpush3.msra.mxu1 %v1962_v44  ;;  %2994 = vmatprep.mubr.msk.f32.mxu0 %vm3287_vm2, %v3284_v0 }
 0x16d   :  { %2997 = vmatprep.subr.mxu0 %v3284_v0  ;;  %3079 = vmatprep.mubr.msk.f32.mxu1 %vm3287_vm2, %v3284_v0 }
 0x16e   :  { %3082 = vmatprep.subr.mxu1 %v3284_v0 }
 0x172   :  { %2995 = vmatmul.mubr.f32.vlgmr.msra.gmra.mrb[0].mxu0 %v3390_v31 }
 0x173   :  { %2998 = vmatpush3.msra.mxu0 %v3452_v52  ;;  %3080 = vmatmul.mubr.f32.vlgmr.msra.gmra.mrb[0].mxu1 %v3390_v31 }
 0x174   :  { %3083 = vmatpush3.msra.mxu1 %v3406_v38  ;;  %2999 = vmatprep.mubr.msk.f32.mxu0 %vm3287_vm2, %v3284_v0 }
 0x175   :  { %3002 = vmatprep.subr.mxu0 %v3284_v0  ;;  %3084 = vmatprep.mubr.msk.f32.mxu1 %vm3287_vm2, %v3284_v0 }
 0x176   :  { %3087 = vmatprep.subr.mxu1 %v3284_v0 }
 0x17a   :  { %3000 = vmatmul.mubr.f32.vlgmr.msra.gmra.mrb[0].mxu0 %v1035_v63 }
 0x17b   :  { %3003 = vmatpush3.msra.mxu0 %v1046_v1  ;;  %3085 = vmatmul.mubr.f32.vlgmr.msra.gmra.mrb[0].mxu1 %v3390_v31  ;;  %v3293_v31 = vmov 15  }
 0x17c   :  { %3088 = vmatpush3.msra.mxu1 %v2334_v59  ;;  %3004 = vmatprep.mubr.msk.f32.mxu0 %vm3287_vm2, %v3284_v0 }
 0x17d   :  { %3007 = vmatprep.subr.mxu0 %v3284_v0  ;;  %3089 = vmatprep.mubr.msk.f32.mxu1 %vm3287_vm2, %v3284_v0 }
 0x17e   :  { %3092 = vmatprep.subr.mxu1 %v3284_v0 }
 0x182   :  { %3005 = vmatmul.mubr.f32.vlgmr.msra.gmra.mrb[0].mxu0 %v3450_v51 }
 0x183   :  { %3008 = vmatpush3.msra.mxu0 %v1043_v55  ;;  %3090 = vmatmul.mubr.f32.vlgmr.msra.gmra.mrb[0].mxu1 %v1035_v63 }
 0x184   :  { %3093 = vmatpush3.msra.mxu1 %v2414_v5  ;;  %3009 = vmatprep.mubr.msk.f32.mxu0 %vm3287_vm2, %v3284_v0 }
 0x185   :  { %3012 = vmatprep.subr.mxu0 %v3284_v0  ;;  %3094 = vmatprep.mubr.msk.f32.mxu1 %vm3287_vm2, %v3284_v0 }
 0x186   :  { %3097 = vmatprep.subr.mxu1 %v3284_v0 }
 0x18a   :  { %3010 = vmatmul.mubr.f32.vlgmr.msra.gmra.mrb[0].mxu0 %v1032_v53 }
 0x18b   :  { %3013 = vmatpush3.msra.mxu0 %v3452_v52  ;;  %3095 = vmatmul.mubr.f32.vlgmr.msra.gmra.mrb[0].mxu1 %v3450_v51 }
 0x18c   :  { %3098 = vmatpush3.msra.mxu1 %v2411_v62  ;;  %3014 = vmatprep.mubr.msk.f32.mxu0 %vm3287_vm2, %v3284_v0 }
 0x18d   :  { %3017 = vmatprep.subr.mxu0 %v3284_v0  ;;  %3099 = vmatprep.mubr.msk.f32.mxu1 %vm3287_vm2, %v3284_v0 }
 0x18e   :  { %3102 = vmatprep.subr.mxu1 %v3284_v0 }
 0x192   :  { %3015 = vmatmul.mubr.f32.vlgmr.msra.gmra.mrb[0].mxu0 %v1033_v57 }
 0x193   :  { %3018 = vmatpush3.msra.mxu0 %v1044_v58  ;;  %3100 = vmatmul.mubr.f32.vlgmr.msra.gmra.mrb[0].mxu1 %v1032_v53 }
 0x194   :  { %3103 = vmatpush3.msra.mxu1 %v2334_v59  ;;  %3019 = vmatprep.mubr.msk.f32.mxu0 %vm3287_vm2, %v3284_v0 }
 0x195   :  { %3022 = vmatprep.subr.mxu0 %v3284_v0  ;;  %3104 = vmatprep.mubr.msk.f32.mxu1 %vm3287_vm2, %v3284_v0 }
 0x196   :  { %3107 = vmatprep.subr.mxu1 %v3284_v0 }
 0x19a   :  { %3020 = vmatmul.mubr.f32.vlgmr.msra.gmra.mrb[0].mxu0 %v3450_v51 }
 0x19b   :  { %3023 = vmatpush3.msra.mxu0 %v3452_v52  ;;  %3105 = vmatmul.mubr.f32.vlgmr.msra.gmra.mrb[0].mxu1 %v1033_v57 }
 0x19c   :  { %3108 = vmatpush3.msra.mxu1 %v2412_v3  ;;  %3024 = vmatprep.mubr.msk.f32.mxu0 %vm3287_vm2, %v3284_v0 }
 0x19d   :  { %3109 = vmatprep.mubr.msk.f32.mxu1 %vm3287_vm2, %v3284_v0  ;;  %3112 = vmatprep.subr.mxu1 %v3284_v0 }
 0x1a2   :  { %3025 = vmatmul.mubr.f32.vlgmr.msra.gmra.mrb[0].mxu0 %v3450_v51 }
 0x1a3   :  { %3110 = vmatmul.mubr.f32.vlgmr.msra.gmra.mrb[0].mxu1 %v3450_v51 }
 0x1a4   :  { %3113 = vmatpush3.msra.mxu1 %v2334_v59  ;;  %3114 = vmatprep.mubr.msk.f32.mxu1 %vm3287_vm2, %v3284_v0 }
 0x1ab   :  { %3115 = vmatmul.mubr.f32.vlgmr.msra.gmra.mrb[0].mxu1 %v3450_v51 }
 0x275   :  { %v1407_v6 = vpop.f32.mrb[0].mxu0 }
 0x276   :  { %v3026_v7 = vpop.f32.mrb[1].mxu0  ;;  %v1413_v8 = vsel %vm1412_vm5, %v1407_v6, 0.0  ;;  %v1417_v9 = vmul.f32 %v1407_v6, %v1407_v6 }
 0x277   :  { %1414 = vadd.xlane.f32.xlu0 %v1413_v8 }
 0x278   :  { %v1418_v10 = vsel %vm1412_vm5, %v1417_v9, 0.0 }
 0x27b   :  { %1419 = vadd.xlane.f32.xlu0 %v1418_v10 }
 0x27e   :  { %v2775_v11 = vpop.f32.mrb[0].mxu1 }
 0x27f   :  { %v3116_v12 = vpop.f32.mrb[1].mxu1  ;;  %v2780_v13 = vsel %vm1412_vm5, %v2775_v11, 0.0  ;;  %v2784_v14 = vmul.f32 %v2775_v11, %v2775_v11 }
 0x280   :  { %2781 = vadd.xlane.f32.xlu1 %v2780_v13 }
 0x281   :  { %v2785_v0 = vsel %vm1412_vm5, %v2784_v14, 0.0 }
 0x282   :  { %2786 = vadd.xlane.f32.xlu0 %v2785_v0 }
 0x304   :  { %v1415_v16 = vpop.xlane.xlu0 %1414 }
 0x308   :  { %v1420_v17 = vpop.xlane.xlu0 %1419 }
 0x30d   :  { %v2782_v18 = vpop.xlane.xlu1 %2781 }
 0x30e   :  { %v2783_v19 = vadd.f32 %v2782_v18, %v1415_v16 }
 0x30f   :  { %v2787_v20 = vpop.xlane.xlu0 %2786 }
 0x310   :  { %v2789_v21 = vmul.f32 0.027777778, %v2783_v19  ;;  %v2788_v22 = vadd.f32 %v2787_v20, %v1420_v17 }
 0x312   :  { %v2791_v23 = vmul.f32 %v2789_v21, %v2789_v21  ;;  %v2790_v24 = vmul.f32 0.027777778, %v2788_v22 }
 0x314   :  { %v2792_v25 = vsub.f32 %v2790_v24, %v2791_v23 }
 0x316   :  { %v2793_v26 = vadd.f32 1e-05, %v2792_v25 }
 0x318   :  { %3206 = vrsqrt.f32 %v2793_v26 }
 0x322   :  { %v3207_v28 = vpop.eup %3206 }
 0x323   :  { %v2795_v29 = vmul.f32 %v3207_v28, %v3338_v2 }
 0x325   :  { %2804 = vperm.xlu0 %3201, %v2795_v29   ;;  %v2796_v30 = vmul.f32 %v2795_v29, %v2789_v21 }
 0x327   :  { %2798 = vrot.lane.b32.xlu1 %v2796_v30, %s3285_s6 }
 0x329   :  { %3205 = vset.pattern.permute.xlu0 %v3293_v31 }
 0x399   :  { %v2799_v32 = vpop.permute.xlu1 %2798 }
 0x39a   :  { %v2801_v33 = vsub.f32 %v3338_v2, %v2799_v32 }
 0x39c   :  { %2810 = vperm.xlu1 %3202, %v2801_v33  }
 0x3a0   :  { %3203 = vset.pattern.permute.xlu1 %v3294_v34 }
 0x3a1   :  { %2817 = vperm.xlu1 %3203, %v3338_v2  }
 0x3a4   :  { %v2805_v35 = vpop.permute.xlu0 %2804 }
 0x3a5   :  { %3204 = vset.pattern.permute.xlu1 %v3293_v31  ;;  %v2807_v36 = vmul.f32 %v2805_v35, %v1407_v6  ;;  %v2835_v37 = vmul.f32 %v2805_v35, %v2775_v11 }
 0x3a6   :  { %2829 = vperm.xlu1 %3204, %v3338_v2  }
 0x41b   :  { %v2811_v38 = vpop.permute.xlu1 %2810 }
 0x41c   :  { %v2813_v39 = vadd.f32 %v2811_v38, %v2807_v36  ;;  %v2836_v40 = vadd.f32 %v2835_v37, %v2811_v38 }
 0x41e   :  { %v2814_v41 = vmul.f32 0.1, %v2813_v39  ;;  %v2837_v42 = vmul.f32 0.1, %v2836_v40 }
 0x420   :  { %v2815_v43 = vmax.f32 %v2813_v39, %v2814_v41  ;;  %v2838_v44 = vmax.f32 %v2836_v40, %v2837_v42  ;;  %v2818_v45 = vpop.permute.xlu1 %2817 }
 0x422   :  { %v2820_v46 = vmul.f32 %v2818_v45, %v2815_v43  ;;  %v2839_v47 = vmul.f32 %v2838_v44, %v2818_v45 }
 0x424   :  { %v2821_v48 = vsel %vm1412_vm5, %v2820_v46, 0.0  ;;  %v2840_v49 = vsel %vm1412_vm5, %v2839_v47, 0.0 }
 0x425   :  { %v2822_v50 = vrot.slane %v2821_v48, 4  ;;  %v2841_v51 = vrot.slane %v2840_v49, 4  ;;  %v2830_v59 = vpop.permute.xlu1 %2829 }
 0x427   :  { %v2823_v2 = vadd.f32 %v2822_v50, %v2821_v48  ;;  %v2842_v52 = vadd.f32 %v2841_v51, %v2840_v49 }
 0x429   :  { %v2824_v53 = vrot.slane %v2823_v2, 2  ;;  %v2843_v54 = vrot.slane %v2842_v52, 2 }
 0x42b   :  { %v2825_v55 = vadd.f32 %v2824_v53, %v2823_v2  ;;  %v2844_v56 = vadd.f32 %v2843_v54, %v2842_v52 }
 0x42d   :  { %v2826_v57 = vrot.slane %v2825_v55, 1  ;;  %v2845_v58 = vrot.slane %v2844_v56, 1 }
 0x42f   :  { %v2827_v60 = vadd.f32 %v2826_v57, %v2825_v55  ;;  %v2846_v61 = vadd.f32 %v2845_v58, %v2844_v56 }
 0x431   :  { %v2832_v62 = vadd.f32 %v2830_v59, %v2827_v60  ;;  %v2847_v63 = vadd.f32 %v2846_v61, %v2830_v59 }
 0x433   :  { %2834 = vst.msk [vmem:[#allocation8] sm:$0x1] %vm2833_vm6, %v2832_v62  ;;  %2848 = vst.msk [vmem:[#allocation8 + $0x1] sm:$0x1] %vm2833_vm6, %v2847_v63 }
 0x434   :  { %3263 = shalt.err (!%p3260_p6)
}
 0x435   :  { %s3264_s15 = scalar_lea.hbm %s3540_s2, 32 }
 0x436   :  { %p3265_p7 = scmp.ne.s32.totalorder %s3540_s2, %s3264_s15  ;;  %p3268_p8 = scmp.lt.u32.totalorder %s3264_s15, %s3540_s2 }
 0x438   :  { %p3270_p9 = pnand %p3268_p8, %p3265_p7 }
 0x43a   :  { %3273 = shalt.err (!%p3270_p9)
}
 0x43b   :  { %2858 = dma.vmem_to_hbm [thread:$0]  %s2856_s11, 32, %s3540_s2, [#allocation5]  }
 0x43c   :  { %3278 = dma.done.wait [#allocation5], 32  }
 0x43d   :  { %3279 = vsyncadd [#allocation5], 4294967264 }
 0x43e   :  { %2862 = vsyncpa [#allocation4], 1 }
 0x43f   :  { %2863 = vsyncpa [#allocation7], 1 }
 0x440   :  { %2864 = vsyncpa [#allocation5], 1 }

</bundles_post_ra>
